<compile_context>
chip_gen: v7x
topology: tpu7x:2x2x1
jax: 0.10.0
libtpu: 0.0.40
codegen_flags: <defaults>
</compile_context>

<pallas_src>
import functools

import jax
import jax.numpy as jnp
import numpy as np
from jax.experimental import pallas as pl
from jax.experimental.pallas import tpu as pltpu


def conv_block_kernel(x_hbm, w3t_ref, w1t_ref, b3_ref, a_ref, c_ref, out_ref,
                      xbuf, col_ref, sem, *, wp, tile, win, cinp, cout):
    """One (batch n, row-tile t) grid step, all channel-major.

    x_hbm  : (N, cinp, L_in)     bf16  raw HBM ref (pl.ANY), windows DMA'd manually
    w3t_ref: (coutp, 9*cinp)     bf16  3x3 taps, rows=Cout, cols k-major (k=kh*3+kw)
    w1t_ref: (coutp, cinp)       bf16  1x1 skip-conv weights
    b3_ref : (coutp, 1)          f32   3x3 conv bias
    a_ref  : (coutp, 1)          f32   BN scale  = gamma * rsqrt(var + eps)
    c_ref  : (coutp, 1)          f32   a*b1 + beta - a*mean  (1x1 bias + BN shift)
    out_ref: (Cout, tile)        out   channel-major output tile (lane-dense)
    xbuf   : (2, cinp, win)      bf16  double-buffered activation window
    col_ref: (9*cinp, tile)      bf16  im2col scratch (single K=9*cinp operand)
    sem    : DMA sems (2,)
    """
    n = pl.program_id(0)
    t = pl.program_id(1)
    nt = pl.num_programs(1)
    slot = jax.lax.rem(t, 2)

    def window_copy(tile_idx, slot_idx):
        base = pl.multiple_of(tile_idx * tile, 128)
        return pltpu.make_async_copy(
            x_hbm.at[n, :, pl.ds(base, win)], xbuf.at[slot_idx], sem.at[slot_idx])

    # First row-tile of each batch fetches its own window (chaining never
    # crosses batches, so megacore-splitting the batch axis stays safe).
    @pl.when(t == 0)
    def _():
        window_copy(t, slot).start()

    window_copy(t, slot).wait()

    # Prefetch the next row-tile's window of the SAME batch (overlap DMA/compute).
    @pl.when(t + 1 < nt)
    def _():
        window_copy(t + 1, 1 - slot).start()

    # Assemble the single K = 9*cinp matmul operand: 9 lane-shifted copies of
    # the window, stacked along sublanes (cinp is a multiple of 16, so every
    # slab write is aligned to the bf16 sublane tiling).
    xw = xbuf.at[slot]                                    # (cinp, win) bf16 view
    center = None
    for k in range(9):
        kh, kw = divmod(k, 3)
        off = kh * wp + kw
        piece = xw[:, off:off + tile]                     # (cinp, tile) bf16
        if k == 4:
            center = piece                                # center tap == unpadded input
        col_ref[k * cinp:(k + 1) * cinp, :] = piece

    # 3x3 conv: ONE bf16 MXU matmul, f32 accumulation, result already (coutp, tile).
    y1 = jnp.dot(w3t_ref[...], col_ref[...], preferred_element_type=jnp.float32)
    # Dropout: identity (eval mode).  ReLU on the 3x3 branch only.
    y1 = jnp.maximum(y1 + b3_ref[...], 0.0)
    # 1x1 skip branch from the center tap (bias folded into c_ref).
    y2 = jnp.dot(w1t_ref[...], center, preferred_element_type=jnp.float32)
    # BatchNorm (eval), folded: single scale multiply + shift.
    y = a_ref[...] * (y1 + y2) + c_ref[...]               # (coutp, tile) f32

    out_ref[...] = y[:cout, :].astype(out_ref.dtype)      # lane-dense, no transpose


def conv_block_forward(x_nchw, params, *, eps=1e-5, tile=512,
                       out_dtype=jnp.float32):
    """Pallas-backed ConvBlock forward. x_nchw: (N, Cin, H, W) -> (N, Cout, H, W).

    `tile` = output rows (of the width-padded flat image) per grid step; must
    be a multiple of 128.  512-1024 amortizes per-step overhead on large
    images; pass out_dtype=jnp.bfloat16 to halve output HBM traffic.
    """
    N, Cin, H, W = (int(d) for d in x_nchw.shape)
    w3 = params["w3"]                                  # (3, 3, Cin, Cout) HWIO
    Cout = int(w3.shape[-1])
    assert tile % 128 == 0

    Wp = W + 2                                         # padded width
    L_valid = H * Wp                                   # valid flat output rows
    nt = -(-L_valid // tile)                           # row tiles per image
    L_out = nt * tile
    win = -(-(tile + 2 * Wp + 2) // 128) * 128         # per-tile halo window (cols)
    L_in = (nt - 1) * tile + win                       # covers the last window
    cinp = -(-Cin // 16) * 16                          # bf16 sublane-pack alignment
    coutp = -(-Cout // 8) * 8                          # f32 sublane alignment

    # --- activations: NCHW is already channel-major.  Zero-pad channels and
    #     spatial borders, flatten over (H+2, W+2), pad length, store bf16.
    x_pad = jnp.pad(x_nchw.astype(jnp.float32),
                    ((0, 0), (0, cinp - Cin), (1, 1), (1, 1)))
    x_flat = x_pad.reshape(N, cinp, (H + 2) * Wp)
    x_flat = jnp.pad(x_flat, ((0, 0), (0, 0), (0, L_in - (H + 2) * Wp)))
    x_flat = x_flat.astype(jnp.bfloat16)               # (N, cinp, L_in)

    # --- fold BatchNorm (eval) + 1x1-conv bias into per-channel scale/shift.
    a = params["gamma"] * jax.lax.rsqrt(params["var"] + eps)
    c = a * params["b1"] + params["beta"] - a * params["mean"]

    # --- weights, channel-major (Cout rows), K ordered k-major to match col_ref.
    w3_r = jnp.pad(w3.reshape(9, Cin, Cout),
                   ((0, 0), (0, cinp - Cin), (0, coutp - Cout)))
    w3t = jnp.transpose(w3_r, (2, 0, 1)).reshape(coutp, 9 * cinp).astype(jnp.bfloat16)
    w1_r = jnp.pad(params["w1"], ((0, cinp - Cin), (0, coutp - Cout)))
    w1t = jnp.transpose(w1_r).astype(jnp.bfloat16)     # (coutp, cinp)

    padc = lambda v: jnp.pad(v, (0, coutp - Cout)).reshape(coutp, 1).astype(jnp.float32)
    b3t, at, ct = padc(params["b3"]), padc(a), padc(c)

    # --- per-generation VMEM budget (v7x: 64 MiB/TC -> 32 MiB; v5e/v6e -> ~64+).
    try:
        vmem_cap = int(pltpu.get_tpu_info().vmem_capacity_bytes)
    except Exception:
        vmem_cap = 64 * 1024 * 1024
    vmem_limit = min(100 * 1024 * 1024, max(32 * 1024 * 1024, vmem_cap // 2))

    kernel = functools.partial(conv_block_kernel, wp=Wp, tile=tile, win=win,
                               cinp=cinp, cout=Cout)

    out = pl.pallas_call(
        kernel,
        out_shape=jax.ShapeDtypeStruct((N, Cout, L_out), out_dtype),
        grid=(N, nt),
        in_specs=[
            pl.BlockSpec(memory_space=pl.ANY),                     # x: manual windows
            pl.BlockSpec((coutp, 9 * cinp), lambda n, t: (0, 0)),  # grid-invariant
            pl.BlockSpec((coutp, cinp), lambda n, t: (0, 0)),
            pl.BlockSpec((coutp, 1), lambda n, t: (0, 0)),
            pl.BlockSpec((coutp, 1), lambda n, t: (0, 0)),
            pl.BlockSpec((coutp, 1), lambda n, t: (0, 0)),
        ],
        out_specs=pl.BlockSpec((None, Cout, tile), lambda n, t: (n, 0, t)),
        scratch_shapes=[
            pltpu.VMEM((2, cinp, win), jnp.bfloat16),   # double-buffered window
            pltpu.VMEM((9 * cinp, tile), jnp.bfloat16), # im2col operand
            pltpu.SemaphoreType.DMA((2,)),
        ],
        compiler_params=pltpu.CompilerParams(
            dimension_semantics=("parallel", "arbitrary"),
            vmem_limit_bytes=vmem_limit),
        cost_estimate=pl.CostEstimate(
            flops=2 * N * L_out * coutp * (9 * cinp + cinp),
            transcendentals=0,
            bytes_accessed=int(x_flat.size * 2 + w3t.size * 2 + w1t.size * 2
                               + N * Cout * L_out * jnp.dtype(out_dtype).itemsize)),
    )(x_flat, w3t, w1t, b3t, at, ct)

    # Output is already channel-major (NCHW-flat): drop padded rows / columns.
    out = out[:, :, :L_valid].reshape(N, Cout, H, Wp)[:, :, :, :W]
    return out


def conv_block_reference(x_nchw, params, *, eps=1e-5):
    """Pure-JAX reference (eval-mode semantics, bf16 storage precision matched)."""
    q = lambda v: v.astype(jnp.bfloat16).astype(jnp.float32)
    x = q(jnp.transpose(x_nchw, (0, 2, 3, 1)))                 # NHWC
    y1 = jax.lax.conv_general_dilated(
        x, q(params["w3"]), window_strides=(1, 1), padding="SAME",
        dimension_numbers=("NHWC", "HWIO", "NHWC"),
        precision=jax.lax.Precision.HIGHEST) + params["b3"]
    y1 = jnp.maximum(y1, 0.0)
    y2 = jnp.einsum("nhwc,cd->nhwd", x, q(params["w1"]),
                    precision=jax.lax.Precision.HIGHEST) + params["b1"]
    y = y1 + y2
    y = (y - params["mean"]) * jax.lax.rsqrt(params["var"] + eps) \
        * params["gamma"] + params["beta"]
    return jnp.transpose(y, (0, 3, 1, 2))


def make_params(key, cin, cout):
    ks = jax.random.split(key, 8)
    return {
        "w3": jax.random.normal(ks[0], (3, 3, cin, cout), jnp.float32) * 0.1,
        "b3": jax.random.normal(ks[1], (cout,), jnp.float32) * 0.05,
        "w1": jax.random.normal(ks[2], (cin, cout), jnp.float32) * 0.1,
        "b1": jax.random.normal(ks[3], (cout,), jnp.float32) * 0.05,
        "gamma": 1.0 + 0.5 * jax.random.normal(ks[4], (cout,), jnp.float32),
        "beta": 0.1 * jax.random.normal(ks[5], (cout,), jnp.float32),
        "mean": 0.1 * jax.random.normal(ks[6], (cout,), jnp.float32),
        "var": 1.0 + 0.5 * jax.random.uniform(ks[7], (cout,), jnp.float32),
    }


if __name__ == "__main__":
    key = jax.random.PRNGKey(0)
    k_x, k_p = jax.random.split(key)

    N, Cin, H, W = 2, 4, 16, 16
    Cout = 8

    x = jax.random.normal(k_x, (N, Cin, H, W), jnp.float32)
    params = make_params(k_p, Cin, Cout)

    # tile=128 here so the small test runs >1 row-tile per batch and exercises
    # the cross-step DMA prefetch chain (production default is tile=512).
    fwd = jax.jit(functools.partial(conv_block_forward, tile=128))
    y = jax.block_until_ready(fwd(x, params))

    y_ref = jax.block_until_ready(conv_block_reference(x, params))
    np.testing.assert_allclose(np.asarray(y), np.asarray(y_ref),
                               rtol=2e-3, atol=2e-3)
    assert y.shape == (N, Cout, H, W)

    print("KERNEL_OK")
</pallas_src>

<mosaic_0001>
module attributes {stable_mosaic.version = 11 : i64} {
  func.func @conv_block_kernel(%arg0: i32, %arg1: i32, %arg2: memref<2x16x512xbf16, #tpu.memory_space<any>>, %arg3: memref<8x144xbf16, #tpu.memory_space<vmem>>, %arg4: memref<8x16xbf16, #tpu.memory_space<vmem>>, %arg5: memref<8x1xf32, #tpu.memory_space<vmem>>, %arg6: memref<8x1xf32, #tpu.memory_space<vmem>>, %arg7: memref<8x1xf32, #tpu.memory_space<vmem>>, %arg8: memref<1x8x128xf32, #tpu.memory_space<vmem>>, %arg9: memref<2x16x256xbf16, #tpu.memory_space<vmem>>, %arg10: memref<144x128xbf16, #tpu.memory_space<vmem>>, %arg11: memref<2x!tpu.dma_semaphore, #tpu.memory_space<semaphore_mem>>) attributes {dimension_semantics = [#tpu.dimension_semantics<parallel>, #tpu.dimension_semantics<arbitrary>], iteration_bounds = array<i64: 2, 3>, scalar_prefetch = 0 : i64, scratch_operands = 3 : i64, tpu.core_type = #tpu.core_type<tc>, window_params = [{}, {pipeline_mode = #tpu.pipeline_mode<synchronous>, transform_indices = @transform_1, window_bounds = array<i64: 8, 144>}, {pipeline_mode = #tpu.pipeline_mode<synchronous>, transform_indices = @transform_2, window_bounds = array<i64: 8, 16>}, {pipeline_mode = #tpu.pipeline_mode<synchronous>, transform_indices = @transform_3, window_bounds = array<i64: 8, 1>}, {pipeline_mode = #tpu.pipeline_mode<synchronous>, transform_indices = @transform_4, window_bounds = array<i64: 8, 1>}, {pipeline_mode = #tpu.pipeline_mode<synchronous>, transform_indices = @transform_5, window_bounds = array<i64: 8, 1>}, {transform_indices = @transform_6, window_bounds = array<i64: 1, 8, 128>}]} {
    %c2_i32 = arith.constant 2 : i32
    %0 = arith.remsi %arg1, %c2_i32 : i32
    %c0_i32 = arith.constant 0 : i32
    %1 = arith.cmpi eq, %arg1, %c0_i32 : i32
    %2 = arith.extui %1 : i1 to i32
    %c0_i32_0 = arith.constant 0 : i32
    %3 = arith.cmpi ne, %2, %c0_i32_0 : i32
    scf.if %3 {
      %c128_i32_59 = arith.constant 128 : i32
      %72 = arith.muli %arg1, %c128_i32_59 : i32
      %73 = tpu.assume_multiple %72, 128 : i32
      %c0_i32_60 = arith.constant 0 : i32
      %74 = tpu.memref_slice %arg2[%arg0, %c0_i32_60, %73] : memref<2x16x512xbf16, #tpu.memory_space<any>> -> memref<1x16x256xbf16, #tpu.memory_space<any>>
      %75 = tpu.memref_squeeze %74 : memref<1x16x256xbf16, #tpu.memory_space<any>> -> memref<16x256xbf16, #tpu.memory_space<any>>
      %c0_i32_61 = arith.constant 0 : i32
      %c0_i32_62 = arith.constant 0 : i32
      %76 = tpu.memref_slice %arg9[%0, %c0_i32_61, %c0_i32_62] : memref<2x16x256xbf16, #tpu.memory_space<vmem>> -> memref<1x16x256xbf16, #tpu.memory_space<vmem>>
      %77 = tpu.memref_squeeze %76 : memref<1x16x256xbf16, #tpu.memory_space<vmem>> -> memref<16x256xbf16, #tpu.memory_space<vmem>>
      %78 = tpu.memref_slice %arg11[%0] : memref<2x!tpu.dma_semaphore, #tpu.memory_space<semaphore_mem>> -> memref<1x!tpu.dma_semaphore, #tpu.memory_space<semaphore_mem>>
      %79 = tpu.memref_squeeze %78 : memref<1x!tpu.dma_semaphore, #tpu.memory_space<semaphore_mem>> -> memref<!tpu.dma_semaphore, #tpu.memory_space<semaphore_mem>>
      tpu.enqueue_dma source(%75 : memref<16x256xbf16, #tpu.memory_space<any>>) target(%77 : memref<16x256xbf16, #tpu.memory_space<vmem>>) target_semaphore(%79 : memref<!tpu.dma_semaphore, #tpu.memory_space<semaphore_mem>>)
    } else {
    }
    %c128_i32 = arith.constant 128 : i32
    %4 = arith.muli %arg1, %c128_i32 : i32
    %5 = tpu.assume_multiple %4, 128 : i32
    %c0_i32_1 = arith.constant 0 : i32
    %6 = tpu.memref_slice %arg2[%arg0, %c0_i32_1, %5] : memref<2x16x512xbf16, #tpu.memory_space<any>> -> memref<1x16x256xbf16, #tpu.memory_space<any>>
    %7 = tpu.memref_squeeze %6 : memref<1x16x256xbf16, #tpu.memory_space<any>> -> memref<16x256xbf16, #tpu.memory_space<any>>
    %c0_i32_2 = arith.constant 0 : i32
    %c0_i32_3 = arith.constant 0 : i32
    %8 = tpu.memref_slice %arg9[%0, %c0_i32_2, %c0_i32_3] : memref<2x16x256xbf16, #tpu.memory_space<vmem>> -> memref<1x16x256xbf16, #tpu.memory_space<vmem>>
    %9 = tpu.memref_squeeze %8 : memref<1x16x256xbf16, #tpu.memory_space<vmem>> -> memref<16x256xbf16, #tpu.memory_space<vmem>>
    %10 = tpu.memref_slice %arg11[%0] : memref<2x!tpu.dma_semaphore, #tpu.memory_space<semaphore_mem>> -> memref<1x!tpu.dma_semaphore, #tpu.memory_space<semaphore_mem>>
    %11 = tpu.memref_squeeze %10 : memref<1x!tpu.dma_semaphore, #tpu.memory_space<semaphore_mem>> -> memref<!tpu.dma_semaphore, #tpu.memory_space<semaphore_mem>>
    tpu.wait_dma2 semaphore(%11 : memref<!tpu.dma_semaphore, #tpu.memory_space<semaphore_mem>>) src(%7 : memref<16x256xbf16, #tpu.memory_space<any>>) dst(%9 : memref<16x256xbf16, #tpu.memory_space<vmem>>)
    %c1_i32 = arith.constant 1 : i32
    %12 = arith.addi %arg1, %c1_i32 : i32
    %c3_i32 = arith.constant 3 : i32
    %13 = arith.cmpi slt, %12, %c3_i32 : i32
    %14 = arith.extui %13 : i1 to i32
    %c0_i32_4 = arith.constant 0 : i32
    %15 = arith.cmpi ne, %14, %c0_i32_4 : i32
    scf.if %15 {
      %c1_i32_59 = arith.constant 1 : i32
      %72 = arith.addi %arg1, %c1_i32_59 : i32
      %c1_i32_60 = arith.constant 1 : i32
      %73 = arith.subi %c1_i32_60, %0 : i32
      %c128_i32_61 = arith.constant 128 : i32
      %74 = arith.muli %72, %c128_i32_61 : i32
      %75 = tpu.assume_multiple %74, 128 : i32
      %c0_i32_62 = arith.constant 0 : i32
      %76 = tpu.memref_slice %arg2[%arg0, %c0_i32_62, %75] : memref<2x16x512xbf16, #tpu.memory_space<any>> -> memref<1x16x256xbf16, #tpu.memory_space<any>>
      %77 = tpu.memref_squeeze %76 : memref<1x16x256xbf16, #tpu.memory_space<any>> -> memref<16x256xbf16, #tpu.memory_space<any>>
      %c0_i32_63 = arith.constant 0 : i32
      %c0_i32_64 = arith.constant 0 : i32
      %78 = tpu.memref_slice %arg9[%73, %c0_i32_63, %c0_i32_64] : memref<2x16x256xbf16, #tpu.memory_space<vmem>> -> memref<1x16x256xbf16, #tpu.memory_space<vmem>>
      %79 = tpu.memref_squeeze %78 : memref<1x16x256xbf16, #tpu.memory_space<vmem>> -> memref<16x256xbf16, #tpu.memory_space<vmem>>
      %80 = tpu.memref_slice %arg11[%73] : memref<2x!tpu.dma_semaphore, #tpu.memory_space<semaphore_mem>> -> memref<1x!tpu.dma_semaphore, #tpu.memory_space<semaphore_mem>>
      %81 = tpu.memref_squeeze %80 : memref<1x!tpu.dma_semaphore, #tpu.memory_space<semaphore_mem>> -> memref<!tpu.dma_semaphore, #tpu.memory_space<semaphore_mem>>
      tpu.enqueue_dma source(%77 : memref<16x256xbf16, #tpu.memory_space<any>>) target(%79 : memref<16x256xbf16, #tpu.memory_space<vmem>>) target_semaphore(%81 : memref<!tpu.dma_semaphore, #tpu.memory_space<semaphore_mem>>)
    } else {
    }
    %c0_i32_5 = arith.constant 0 : i32
    %c0_i32_6 = arith.constant 0 : i32
    %16 = tpu.memref_slice %arg9[%0, %c0_i32_5, %c0_i32_6] : memref<2x16x256xbf16, #tpu.memory_space<vmem>> -> memref<1x16x256xbf16, #tpu.memory_space<vmem>>
    %17 = tpu.memref_squeeze %16 : memref<1x16x256xbf16, #tpu.memory_space<vmem>> -> memref<16x256xbf16, #tpu.memory_space<vmem>>
    %c0 = arith.constant 0 : index
    %c0_7 = arith.constant 0 : index
    %18 = vector.load %17[%c0, %c0_7] : memref<16x256xbf16, #tpu.memory_space<vmem>>, vector<16x128xbf16>
    %c0_8 = arith.constant 0 : index
    %c0_9 = arith.constant 0 : index
    %19 = vector.load %arg10[%c0_8, %c0_9] : memref<144x128xbf16, #tpu.memory_space<vmem>>, vector<16x128xbf16>
    tpu.vector_store %arg10[%c0_8, %c0_9], %18 {strides = array<i32>} : memref<144x128xbf16, #tpu.memory_space<vmem>>, vector<16x128xbf16>,
    %c0_i32_10 = arith.constant 0 : i32
    %c0_i32_11 = arith.constant 0 : i32
    %20 = tpu.memref_slice %arg9[%0, %c0_i32_10, %c0_i32_11] : memref<2x16x256xbf16, #tpu.memory_space<vmem>> -> memref<1x16x256xbf16, #tpu.memory_space<vmem>>
    %21 = tpu.memref_squeeze %20 : memref<1x16x256xbf16, #tpu.memory_space<vmem>> -> memref<16x256xbf16, #tpu.memory_space<vmem>>
    %c0_12 = arith.constant 0 : index
    %c1 = arith.constant 1 : index
    %22 = vector.load %21[%c0_12, %c1] : memref<16x256xbf16, #tpu.memory_space<vmem>>, vector<16x128xbf16>
    %c16 = arith.constant 16 : index
    %c0_13 = arith.constant 0 : index
    %23 = vector.load %arg10[%c16, %c0_13] : memref<144x128xbf16, #tpu.memory_space<vmem>>, vector<16x128xbf16>
    tpu.vector_store %arg10[%c16, %c0_13], %22 {strides = array<i32>} : memref<144x128xbf16, #tpu.memory_space<vmem>>, vector<16x128xbf16>,
    %c0_i32_14 = arith.constant 0 : i32
    %c0_i32_15 = arith.constant 0 : i32
    %24 = tpu.memref_slice %arg9[%0, %c0_i32_14, %c0_i32_15] : memref<2x16x256xbf16, #tpu.memory_space<vmem>> -> memref<1x16x256xbf16, #tpu.memory_space<vmem>>
    %25 = tpu.memref_squeeze %24 : memref<1x16x256xbf16, #tpu.memory_space<vmem>> -> memref<16x256xbf16, #tpu.memory_space<vmem>>
    %c0_16 = arith.constant 0 : index
    %c2 = arith.constant 2 : index
    %26 = vector.load %25[%c0_16, %c2] : memref<16x256xbf16, #tpu.memory_space<vmem>>, vector<16x128xbf16>
    %c32 = arith.constant 32 : index
    %c0_17 = arith.constant 0 : index
    %27 = vector.load %arg10[%c32, %c0_17] : memref<144x128xbf16, #tpu.memory_space<vmem>>, vector<16x128xbf16>
    tpu.vector_store %arg10[%c32, %c0_17], %26 {strides = array<i32>} : memref<144x128xbf16, #tpu.memory_space<vmem>>, vector<16x128xbf16>,
    %c0_i32_18 = arith.constant 0 : i32
    %c0_i32_19 = arith.constant 0 : i32
    %28 = tpu.memref_slice %arg9[%0, %c0_i32_18, %c0_i32_19] : memref<2x16x256xbf16, #tpu.memory_space<vmem>> -> memref<1x16x256xbf16, #tpu.memory_space<vmem>>
    %29 = tpu.memref_squeeze %28 : memref<1x16x256xbf16, #tpu.memory_space<vmem>> -> memref<16x256xbf16, #tpu.memory_space<vmem>>
    %c0_20 = arith.constant 0 : index
    %c18 = arith.constant 18 : index
    %30 = vector.load %29[%c0_20, %c18] : memref<16x256xbf16, #tpu.memory_space<vmem>>, vector<16x128xbf16>
    %c48 = arith.constant 48 : index
    %c0_21 = arith.constant 0 : index
    %31 = vector.load %arg10[%c48, %c0_21] : memref<144x128xbf16, #tpu.memory_space<vmem>>, vector<16x128xbf16>
    tpu.vector_store %arg10[%c48, %c0_21], %30 {strides = array<i32>} : memref<144x128xbf16, #tpu.memory_space<vmem>>, vector<16x128xbf16>,
    %c0_i32_22 = arith.constant 0 : i32
    %c0_i32_23 = arith.constant 0 : i32
    %32 = tpu.memref_slice %arg9[%0, %c0_i32_22, %c0_i32_23] : memref<2x16x256xbf16, #tpu.memory_space<vmem>> -> memref<1x16x256xbf16, #tpu.memory_space<vmem>>
    %33 = tpu.memref_squeeze %32 : memref<1x16x256xbf16, #tpu.memory_space<vmem>> -> memref<16x256xbf16, #tpu.memory_space<vmem>>
    %c0_24 = arith.constant 0 : index
    %c19 = arith.constant 19 : index
    %34 = vector.load %33[%c0_24, %c19] : memref<16x256xbf16, #tpu.memory_space<vmem>>, vector<16x128xbf16>
    %c64 = arith.constant 64 : index
    %c0_25 = arith.constant 0 : index
    %35 = vector.load %arg10[%c64, %c0_25] : memref<144x128xbf16, #tpu.memory_space<vmem>>, vector<16x128xbf16>
    tpu.vector_store %arg10[%c64, %c0_25], %34 {strides = array<i32>} : memref<144x128xbf16, #tpu.memory_space<vmem>>, vector<16x128xbf16>,
    %c0_i32_26 = arith.constant 0 : i32
    %c0_i32_27 = arith.constant 0 : i32
    %36 = tpu.memref_slice %arg9[%0, %c0_i32_26, %c0_i32_27] : memref<2x16x256xbf16, #tpu.memory_space<vmem>> -> memref<1x16x256xbf16, #tpu.memory_space<vmem>>
    %37 = tpu.memref_squeeze %36 : memref<1x16x256xbf16, #tpu.memory_space<vmem>> -> memref<16x256xbf16, #tpu.memory_space<vmem>>
    %c0_28 = arith.constant 0 : index
    %c20 = arith.constant 20 : index
    %38 = vector.load %37[%c0_28, %c20] : memref<16x256xbf16, #tpu.memory_space<vmem>>, vector<16x128xbf16>
    %c80 = arith.constant 80 : index
    %c0_29 = arith.constant 0 : index
    %39 = vector.load %arg10[%c80, %c0_29] : memref<144x128xbf16, #tpu.memory_space<vmem>>, vector<16x128xbf16>
    tpu.vector_store %arg10[%c80, %c0_29], %38 {strides = array<i32>} : memref<144x128xbf16, #tpu.memory_space<vmem>>, vector<16x128xbf16>,
    %c0_i32_30 = arith.constant 0 : i32
    %c0_i32_31 = arith.constant 0 : i32
    %40 = tpu.memref_slice %arg9[%0, %c0_i32_30, %c0_i32_31] : memref<2x16x256xbf16, #tpu.memory_space<vmem>> -> memref<1x16x256xbf16, #tpu.memory_space<vmem>>
    %41 = tpu.memref_squeeze %40 : memref<1x16x256xbf16, #tpu.memory_space<vmem>> -> memref<16x256xbf16, #tpu.memory_space<vmem>>
    %c0_32 = arith.constant 0 : index
    %c36 = arith.constant 36 : index
    %42 = vector.load %41[%c0_32, %c36] : memref<16x256xbf16, #tpu.memory_space<vmem>>, vector<16x128xbf16>
    %c96 = arith.constant 96 : index
    %c0_33 = arith.constant 0 : index
    %43 = vector.load %arg10[%c96, %c0_33] : memref<144x128xbf16, #tpu.memory_space<vmem>>, vector<16x128xbf16>
    tpu.vector_store %arg10[%c96, %c0_33], %42 {strides = array<i32>} : memref<144x128xbf16, #tpu.memory_space<vmem>>, vector<16x128xbf16>,
    %c0_i32_34 = arith.constant 0 : i32
    %c0_i32_35 = arith.constant 0 : i32
    %44 = tpu.memref_slice %arg9[%0, %c0_i32_34, %c0_i32_35] : memref<2x16x256xbf16, #tpu.memory_space<vmem>> -> memref<1x16x256xbf16, #tpu.memory_space<vmem>>
    %45 = tpu.memref_squeeze %44 : memref<1x16x256xbf16, #tpu.memory_space<vmem>> -> memref<16x256xbf16, #tpu.memory_space<vmem>>
    %c0_36 = arith.constant 0 : index
    %c37 = arith.constant 37 : index
    %46 = vector.load %45[%c0_36, %c37] : memref<16x256xbf16, #tpu.memory_space<vmem>>, vector<16x128xbf16>
    %c112 = arith.constant 112 : index
    %c0_37 = arith.constant 0 : index
    %47 = vector.load %arg10[%c112, %c0_37] : memref<144x128xbf16, #tpu.memory_space<vmem>>, vector<16x128xbf16>
    tpu.vector_store %arg10[%c112, %c0_37], %46 {strides = array<i32>} : memref<144x128xbf16, #tpu.memory_space<vmem>>, vector<16x128xbf16>,
    %c0_i32_38 = arith.constant 0 : i32
    %c0_i32_39 = arith.constant 0 : i32
    %48 = tpu.memref_slice %arg9[%0, %c0_i32_38, %c0_i32_39] : memref<2x16x256xbf16, #tpu.memory_space<vmem>> -> memref<1x16x256xbf16, #tpu.memory_space<vmem>>
    %49 = tpu.memref_squeeze %48 : memref<1x16x256xbf16, #tpu.memory_space<vmem>> -> memref<16x256xbf16, #tpu.memory_space<vmem>>
    %c0_40 = arith.constant 0 : index
    %c38 = arith.constant 38 : index
    %50 = vector.load %49[%c0_40, %c38] : memref<16x256xbf16, #tpu.memory_space<vmem>>, vector<16x128xbf16>
    %c128 = arith.constant 128 : index
    %c0_41 = arith.constant 0 : index
    %51 = vector.load %arg10[%c128, %c0_41] : memref<144x128xbf16, #tpu.memory_space<vmem>>, vector<16x128xbf16>
    tpu.vector_store %arg10[%c128, %c0_41], %50 {strides = array<i32>} : memref<144x128xbf16, #tpu.memory_space<vmem>>, vector<16x128xbf16>,
    %c0_42 = arith.constant 0 : index
    %c0_43 = arith.constant 0 : index
    %52 = vector.load %arg3[%c0_42, %c0_43] : memref<8x144xbf16, #tpu.memory_space<vmem>>, vector<8x144xbf16>
    %c0_44 = arith.constant 0 : index
    %c0_45 = arith.constant 0 : index
    %53 = vector.load %arg10[%c0_44, %c0_45] : memref<144x128xbf16, #tpu.memory_space<vmem>>, vector<144x128xbf16>
    %cst = arith.constant dense<0.000000e+00> : vector<8x128xf32>
    %54 = tpu.matmul %52, %53, %cst {dimension_numbers = #tpu.dot_dimension_numbers<[1], [0], [0], [1], [0, 0, 1, 1], [], []>} : vector<8x144xbf16>, vector<144x128xbf16>, vector<8x128xf32> -> vector<8x128xf32>
    %c0_46 = arith.constant 0 : index
    %c0_47 = arith.constant 0 : index
    %55 = vector.load %arg5[%c0_46, %c0_47] : memref<8x1xf32, #tpu.memory_space<vmem>>, vector<8x1xf32>
    %56 = vector.broadcast %55 : vector<8x1xf32> to vector<8x128xf32>
    %57 = arith.addf %54, %56 : vector<8x128xf32>
    %cst_48 = arith.constant 0.000000e+00 : f32
    %58 = vector.broadcast %cst_48 : f32 to vector<8x128xf32>
    %59 = arith.maximumf %57, %58 : vector<8x128xf32>
    %c0_49 = arith.constant 0 : index
    %c0_50 = arith.constant 0 : index
    %60 = vector.load %arg4[%c0_49, %c0_50] : memref<8x16xbf16, #tpu.memory_space<vmem>>, vector<8x16xbf16>
    %cst_51 = arith.constant dense<0.000000e+00> : vector<8x128xf32>
    %61 = tpu.matmul %60, %34, %cst_51 {dimension_numbers = #tpu.dot_dimension_numbers<[1], [0], [0], [1], [0, 0, 1, 1], [], []>} : vector<8x16xbf16>, vector<16x128xbf16>, vector<8x128xf32> -> vector<8x128xf32>
    %c0_52 = arith.constant 0 : index
    %c0_53 = arith.constant 0 : index
    %62 = vector.load %arg6[%c0_52, %c0_53] : memref<8x1xf32, #tpu.memory_space<vmem>>, vector<8x1xf32>
    %63 = arith.addf %59, %61 : vector<8x128xf32>
    %64 = vector.broadcast %62 : vector<8x1xf32> to vector<8x128xf32>
    %65 = arith.mulf %64, %63 : vector<8x128xf32>
    %c0_54 = arith.constant 0 : index
    %c0_55 = arith.constant 0 : index
    %66 = vector.load %arg7[%c0_54, %c0_55] : memref<8x1xf32, #tpu.memory_space<vmem>>, vector<8x1xf32>
    %67 = vector.broadcast %66 : vector<8x1xf32> to vector<8x128xf32>
    %68 = arith.addf %65, %67 : vector<8x128xf32>
    %c0_56 = arith.constant 0 : index
    %c0_57 = arith.constant 0 : index
    %c0_58 = arith.constant 0 : index
    %69 = vector.load %arg8[%c0_56, %c0_57, %c0_58] : memref<1x8x128xf32, #tpu.memory_space<vmem>>, vector<1x8x128xf32>
    %70 = vector.shape_cast %69 : vector<1x8x128xf32> to vector<8x128xf32>
    %71 = vector.shape_cast %68 : vector<8x128xf32> to vector<1x8x128xf32>
    tpu.vector_store %arg8[%c0_56, %c0_57, %c0_58], %71 {strides = array<i32>} : memref<1x8x128xf32, #tpu.memory_space<vmem>>, vector<1x8x128xf32>,
    return
  }
  func.func @transform_1(%arg0: i32, %arg1: i32) -> (i32, i32) {
    %c0_i32 = arith.constant 0 : i32
    %c0_i32_0 = arith.constant 0 : i32
    %c0_i32_1 = arith.constant 0 : i32
    return %c0_i32, %c0_i32_0 : i32, i32
  }
  func.func @transform_2(%arg0: i32, %arg1: i32) -> (i32, i32) {
    %c0_i32 = arith.constant 0 : i32
    %c0_i32_0 = arith.constant 0 : i32
    %c0_i32_1 = arith.constant 0 : i32
    return %c0_i32, %c0_i32_0 : i32, i32
  }
  func.func @transform_3(%arg0: i32, %arg1: i32) -> (i32, i32) {
    %c0_i32 = arith.constant 0 : i32
    %c0_i32_0 = arith.constant 0 : i32
    %c0_i32_1 = arith.constant 0 : i32
    return %c0_i32, %c0_i32_0 : i32, i32
  }
  func.func @transform_4(%arg0: i32, %arg1: i32) -> (i32, i32) {
    %c0_i32 = arith.constant 0 : i32
    %c0_i32_0 = arith.constant 0 : i32
    %c0_i32_1 = arith.constant 0 : i32
    return %c0_i32, %c0_i32_0 : i32, i32
  }
  func.func @transform_5(%arg0: i32, %arg1: i32) -> (i32, i32) {
    %c0_i32 = arith.constant 0 : i32
    %c0_i32_0 = arith.constant 0 : i32
    %c0_i32_1 = arith.constant 0 : i32
    return %c0_i32, %c0_i32_0 : i32, i32
  }
  func.func @transform_6(%arg0: i32, %arg1: i32) -> (i32, i32, i32) {
    %c0_i32 = arith.constant 0 : i32
    %c0_i32_0 = arith.constant 0 : i32
    return %arg0, %c0_i32, %arg1 : i32, i32, i32
  }
}

</mosaic_0001>

<bundles_post_ra>
// kernel: conv_block_forward.1
= control target key start
LH: loop header
LB: loop body
LE: loop exit
PB: predicated region body
PF: predicated region fallthrough
CT: control target
= control target key end

     0   :  { %s938_s21 = smov 0   ;;  %s940_s22 = smov 0   ;;  %s1057_s0 = inlined_call_operand.vmem [shape: bf16[2,16,512], index: 0, kind: input, shape index: {}]   ;;  %s1058_s1 = inlined_call_operand.vmem [shape: bf16[8,144], index: 1, kind: input, shape index: {}]   ;;  %s1059_s2 = inlined_call_operand.vmem [shape: bf16[8,16], index: 2, kind: input, shape index: {}]   ;;  %s1060_s3 = inlined_call_operand.vmem [shape: f32[8,1], index: 3, kind: input, shape index: {}]   ;;  %s1061_s4 = inlined_call_operand.vmem [shape: f32[8,1], index: 4, kind: input, shape index: {}]   ;;  %s1062_s5 = inlined_call_operand.vmem [shape: f32[8,1], index: 5, kind: input, shape index: {}]   ;;  %s1063_s6 = inlined_call_operand.vmem [shape: f32[2,8,384], index: 6, kind: output, shape index: {}]  }
   0x1   :  { %s942_s23 = smov 0   ;;  %s944_s24 = smov 0  }
   0x2   :  { %s946_s25 = smov 0  }
   0x3 LB: > { %s25_s26 = sadd.s32 1, %s882_s23  ;;  %s28_s27 = sadd.s32 1, %s886_s24  ;;  %s890_s25 = sphi %s946_s25, %s16_s25   ;;  %s886_s24 = sphi %s944_s24, %s1067_s24   ;;  %s882_s23 = sphi %s942_s23, %s1066_s23   ;;  %s878_s22 = sphi %s940_s22, %s1065_s22   ;;  %s874_s21 = sphi %s938_s21, %s1064_s21  }
   0x4   : > { %p26_p0 = scmp.ge.s32.totalorder %s25_s26, 3  ;;  %p756_p1 = scmp.ge.s32.totalorder %s890_s25, 1 }
   0x5   : > { %p192_p2 = scmp.lt.s32.totalorder %s890_s25, 7 }
   0x6   : > { %s1069_s26 = smov (%p26_p0, %s25_s26), 0  ;;  %s1071_s27 = smov (!%p26_p0, %s28_s27), %s886_s24 }
   0x7   : > { %p193_p3 = pnand %p756_p1, %p192_p2  ;;  %p30_p4 = scmp.ge.s32.totalorder %s1071_s27, 2 }
   0x8   : > { %p218_p5 = scmp.lt.s32.totalorder (!%p193_p3), %s878_s22, 1  ;;  %p220_p6 = scmp.lt.s32.totalorder (!%p193_p3), %s874_s21, 2 }
   0x9   : > { %s1073_s27 = smov (%p30_p4, %s1071_s27), 0  ;;  %196 = sbr.rel (%p193_p3) target bundleno = 427 (0x1ab), region = 40 }
   0xa   : > { %s228_s28 = ssub.s32 (!%p193_p3), 0, %s874_s21  ;;  %p227_p7 = scmp.lt.s32.totalorder (!%p193_p3), %s874_s21, 0 }
   0xb   : > { %s758_s8 = smin.u32 (!%p193_p3), %s874_s21, %s228_s28  ;;  %p759_p8 = scmp.ne.s32.totalorder (!%p193_p3), %s874_s21, 0 }
   0xc   : > { %s230_s9 = sand.u32 (!%p193_p3), 1, %s758_s8  }
   0xd   : > { %s231_s11 = ssub.s32 (!%p193_p3), 0, %s230_s9 }
  0x10   : > { %s219_s29 = scalar_select %p218_p5, %s878_s22, 1 }
  0x11   : > { %s221_s30 = scalar_select %p220_p6, %s874_s21, 2 }
  0x12   : > { %s794_s7 = smul.u32 3, %s219_s29  ;;  %s1075_s11 = smov (!%p227_p7, %s231_s11), %s230_s9 }
  0x13   : > { %236 = sbr.rel (%p759_p8) target bundleno = 30 (0x1e), region = 44  ;;  %s760_s16 = sshll.u32 (!%p759_p8), %s874_s21, 7 }
  0x14   : > { %s223_s10 = sadd.s32 %s794_s7, %s221_s30  ;;  %s761_s17 = sshll.u32 (!%p759_p8), %s878_s22, 3 }
  0x15   : > { %s757_s12 = sshll.u32 %s223_s10, 3  ;;  %s238_s18 = sshra.s32 (!%p759_p8), %s760_s16, 7 }
  0x16   : > { %s982_s15 = scalar_lea.vmem %s1063_s6, %s757_s12  ;;  %s781_s19 = sshll.u32 (!%p759_p8), %s1075_s11, 4 }
  0x17   : > { %s241_s20 = sadd.s32 (!%p759_p8), %s761_s17, %s238_s18  ;;  %s246_s8 = scalar_lea.vmem (!%p759_p8), [#allocation2], %s781_s19 }
  0x18   : > { %s762_s28 = sshll.u32 (!%p759_p8), %s241_s20, 2  ;;  %s247_s9 = scalar_lea.sflag (!%p759_p8), [#allocation4], %s1075_s11 }
  0x19   : > { %s243_s7 = scalar_lea.vmem (!%p759_p8), %s1057_s0, %s762_s28 }
  0x1a   : > { %v265_v0 = vld [vmem:[%s243_s7] sm:$0xf]  ;;  %v267_v1 = vld [vmem:[%s243_s7 + $0x10] sm:$0xf]  ;;  %v269_v2 = vld [vmem:[%s243_s7 + $0x4] sm:$0xf] }
  0x1b   : > { %266 = vst [vmem:[%s246_s8] sm:$0xf] %v265_v0  ;;  %268 = vst [vmem:[%s246_s8 + $0x4] sm:$0xf] %v267_v1  ;;  %v271_v3 = vld [vmem:[%s243_s7 + $0x14] sm:$0xf] }
  0x1c   : > { %270 = vst [vmem:[%s246_s8 + $0x8] sm:$0xf] %v269_v2  ;;  %272 = vst [vmem:[%s246_s8 + $0xc] sm:$0xf] %v271_v3 }
  0x1d   : > { %311 = vsyncadd %s247_s9, 256 }
  0x1e PF: > { %s782_s10 = sshll.u32 %s1075_s11, 4  ;;  %s316_s13 = scalar_lea.sflag [#allocation4], %s1075_s11 }
  0x1f   : > { %s995_s12 = scalar_lea.vmem [#allocation2], %s782_s10 }
  0x20   : > { %870 = dma.done.wait %s316_s13, 256 }
  0x21   : > { %871 = vsyncadd %s316_s13, 4294967040  ;;  %s321_s14 = sadd.s32 1, %s874_s21 }
  0x22   : > { %p767_p9 = scmp.ge.s32.totalorder %s321_s14, 3 }
  0x23   : > { %s326_s16 = ssub.s32 (!%p767_p9), 1, %s1075_s11  ;;  %s783_s17 = sshll.u32 (!%p767_p9), %s874_s21, 7 }
  0x24   : > { %325 = sbr.rel (%p767_p9) target bundleno = 45 (0x2d), region = 85  ;;  %s784_s18 = sadd.s32 (!%p767_p9), 128, %s783_s17 }
  0x25   : > { %s769_s19 = sshll.u32 (!%p767_p9), %s878_s22, 3  ;;  %s328_s20 = sshra.s32 (!%p767_p9), %s784_s18, 7 }
  0x26   : > { %s785_s28 = sshll.u32 (!%p767_p9), %s326_s16, 4  ;;  %s331_s29 = sadd.s32 (!%p767_p9), %s769_s19, %s328_s20 }
  0x27   : > { %s770_s30 = sshll.u32 (!%p767_p9), %s331_s29, 2  ;;  %s336_s10 = scalar_lea.vmem (!%p767_p9), [#allocation2], %s785_s28 }
  0x28   : > { %s333_s9 = scalar_lea.vmem (!%p767_p9), %s1057_s0, %s770_s30  ;;  %s337_s21 = scalar_lea.sflag (!%p767_p9), [#allocation4], %s326_s16 }
  0x29   : > { %v355_v4 = vld [vmem:[%s333_s9] sm:$0xf] (!%p767_p9)  ;;  %v357_v5 = vld [vmem:[%s333_s9 + $0x10] sm:$0xf] (!%p767_p9)  ;;  %v359_v6 = vld [vmem:[%s333_s9 + $0x4] sm:$0xf] (!%p767_p9) }
  0x2a   : > { %356 = vst [vmem:[%s336_s10] sm:$0xf] (!%p767_p9), %v355_v4  ;;  %358 = vst [vmem:[%s336_s10 + $0x4] sm:$0xf] (!%p767_p9), %v357_v5  ;;  %v361_v7 = vld [vmem:[%s333_s9 + $0x14] sm:$0xf] (!%p767_p9) }
  0x2b   : > { %360 = vst [vmem:[%s336_s10 + $0x8] sm:$0xf] %v359_v6  ;;  %362 = vst [vmem:[%s336_s10 + $0xc] sm:$0xf] %v361_v7 }
  0x2c   : > { %401 = vsyncadd %s337_s21, 256 }
  0x2d PF: > { %s892_s22 = smov 126   ;;  %s893_s11 = smov 127   ;;  %v894_v10 = vmov 0   ;;  %v895_v11 = vmov 0.0   ;;  %v1014_v12 = vld [vmem:[%s1058_s1] sm:$0xff]  ;;  %vm522_vm0 = vcmask 130048  }
  0x2e   : > { %526 = vmatprep.subr.bf16.mxu0 %v894_v10  ;;  %847 = vset.pattern.permute.xlu1 %v894_v10  ;;  %s896_s13 = smov 110   ;;  %s897_s14 = smov 109   ;;  %v774_v13 = vcombine.high %v1014_v12, %v1014_v12  ;;  %vm900_vm1 = vmmov 0   ;;  %v611_v14 = vld [vmem:[%s1061_s4] sm:$0xff]  ;;  %vm412_vm2 = vcmask 1039360   ;;  %vm424_vm3 = vcmask 1031168  }
  0x2f   : > { %788 = vmatprep.subr.bf16.mxu1 %v895_v11  ;;  %846 = vset.pattern.permute.xlu0 %v894_v10  ;;  %s899_s18 = smov 92   ;;  %s901_s19 = smov 91   ;;  %v510_v15 = vld [vmem:[%s1060_s3] sm:$0xff]  ;;  %vm436_vm4 = vcmask 900096   ;;  %vm448_vm5 = vcmask 891904   ;;  %vm460_vm6 = vcmask 883712   ;;  %v773_v42 = vcombine.low %v1014_v12, %v1014_v12 }
  0x30   : > { %775 = vmatprep.mubr.msk.bf16.mxu0 %vm522_vm0, %v774_v13  ;;  %790 = vmatprep.mubr.msk.bf16.mxu1 %vm900_vm1, %v895_v11  ;;  %s902_s20 = smov 90   ;;  %v619_v16 = vld [vmem:[%s1062_s5] sm:$0xff]  ;;  %vm472_vm7 = vcmask 752640   ;;  %vm484_vm8 = vcmask 744448   ;;  %vm496_vm9 = vcmask 736256  }
  0x31   : > { %v567_v29 = vld [vmem:[%s1059_s2] sm:$0xf] }
  0x34   : > { %v416_v8 = vld [vmem:[%s995_s12] sm:$0xff]  ;;  %v417_v9 = vld [vmem:[%s995_s12 + $0x8] sm:$0xff]  ;;  %s898_s12 = smov 108  }
  0x35   : > { %420 = vrot.lane.b32.xlu1 %v416_v8, %s892_s22  ;;  %408 = vrot.lane.b32.xlu0 %v416_v8, %s893_s11 }
  0x36   : > { %527 = vmatpush1.bf16.msra.mxu0 %v416_v8 }
  0x37   : > { %528 = vmatprep.subr.bf16.mxu0 %v894_v10 }
  0x39   : > { %422 = vrot.lane.b32.xlu1 %v417_v9, %s892_s22  ;;  %410 = vrot.lane.b32.xlu0 %v417_v9, %s893_s11 }
  0x3d   : > { %434 = vrot.lane.b32.xlu1 %v417_v9, %s896_s13  ;;  %432 = vrot.lane.b32.xlu0 %v416_v8, %s896_s13 }
  0x41   : > { %446 = vrot.lane.b32.xlu1 %v417_v9, %s897_s14  ;;  %444 = vrot.lane.b32.xlu0 %v416_v8, %s897_s14 }
  0x45   : > { %458 = vrot.lane.b32.xlu1 %v417_v9, %s898_s12  ;;  %456 = vrot.lane.b32.xlu0 %v416_v8, %s898_s12 }
  0x49   : > { %470 = vrot.lane.b32.xlu1 %v417_v9, %s899_s18  ;;  %468 = vrot.lane.b32.xlu0 %v416_v8, %s899_s18 }
  0x4d   : > { %482 = vrot.lane.b32.xlu1 %v417_v9, %s901_s19  ;;  %480 = vrot.lane.b32.xlu0 %v416_v8, %s901_s19 }
  0x51   : > { %494 = vrot.lane.b32.xlu1 %v417_v9, %s902_s20  ;;  %492 = vrot.lane.b32.xlu0 %v416_v8, %s902_s20 }
  0x55   : > { %615 = vperm.xlu1 %847, %v611_v14   ;;  %513 = vperm.xlu0 %846, %v510_v15  }
  0x59   : > { %622 = vperm.xlu1 %847, %v619_v16  }
  0xa7   : > { %v421_v17 = vpop.permute.xlu1 %420  ;;  %v409_v18 = vpop.permute.xlu0 %408 }
  0xab   : > { %v423_v19 = vpop.permute.xlu1 %422  ;;  %v411_v20 = vpop.permute.xlu0 %410 }
  0xac   : > { %v413_v21 = vsel %vm412_vm2, %v409_v18, %v411_v20  ;;  %v425_v24 = vsel %vm424_vm3, %v421_v17, %v423_v19 }
  0xad   : > { %529 = vmatpush1.bf16.msra.mxu0 %v413_v21 }
  0xae   : > { %530 = vmatprep.subr.bf16.mxu0 %v894_v10 }
  0xaf   : > { %v435_v22 = vpop.permute.xlu1 %434  ;;  %v433_v23 = vpop.permute.xlu0 %432 }
  0xb0   : > { %v437_v25 = vsel %vm436_vm4, %v433_v23, %v435_v22 }
  0xb1   : > { %531 = vmatpush1.bf16.msra.mxu0 %v425_v24 }
  0xb2   : > { %532 = vmatprep.subr.bf16.mxu0 %v894_v10 }
  0xb3   : > { %v447_v26 = vpop.permute.xlu1 %446  ;;  %v445_v27 = vpop.permute.xlu0 %444 }
  0xb4   : > { %v449_v28 = vsel %vm448_vm5, %v445_v27, %v447_v26 }
  0xb5   : > { %533 = vmatpush1.bf16.msra.mxu0 %v437_v25  ;;  %789 = vmatpush3.bf16.msra.mxu1 %v449_v28 }
  0xb6   : > { %534 = vmatprep.subr.bf16.mxu0 %v894_v10 }
  0xb7   : > { %v459_v30 = vpop.permute.xlu1 %458  ;;  %v457_v31 = vpop.permute.xlu0 %456 }
  0xb8   : > { %791 = vmatmul.mubr.msk.bf16.vlgmr.msra.gmra.mrb[0].mxu1 %vm522_vm0, %v567_v29  ;;  %v461_v32 = vsel %vm460_vm6, %v457_v31, %v459_v30 }
  0xb9   : > { %535 = vmatpush1.bf16.msra.mxu0 %v449_v28 }
  0xba   : > { %536 = vmatprep.subr.bf16.mxu0 %v894_v10 }
  0xbb   : > { %v471_v33 = vpop.permute.xlu1 %470  ;;  %v469_v34 = vpop.permute.xlu0 %468 }
  0xbc   : > { %v473_v35 = vsel %vm472_vm7, %v469_v34, %v471_v33 }
  0xbd   : > { %537 = vmatpush1.bf16.msra.mxu0 %v461_v32 }
  0xbe   : > { %538 = vmatprep.subr.bf16.mxu0 %v894_v10 }
  0xbf   : > { %v483_v36 = vpop.permute.xlu1 %482  ;;  %v481_v37 = vpop.permute.xlu0 %480 }
  0xc0   : > { %v485_v38 = vsel %vm484_vm8, %v481_v37, %v483_v36 }
  0xc1   : > { %539 = vmatpush1.bf16.msra.mxu0 %v473_v35 }
  0xc2   : > { %540 = vmatprep.subr.bf16.mxu0 %v894_v10 }
  0xc3   : > { %v495_v39 = vpop.permute.xlu1 %494  ;;  %v493_v40 = vpop.permute.xlu0 %492 }
  0xc4   : > { %v497_v41 = vsel %vm496_vm9, %v493_v40, %v495_v39 }
  0xc5   : > { %541 = vmatpush1.bf16.msra.mxu0 %v485_v38 }
  0xc6   : > { %542 = vmatprep.subr.bf16.mxu0 %v894_v10 }
  0xc9   : > { %543 = vmatpush1.bf16.msra.mxu0 %v497_v41 }
  0xcc   : > { %559 = vmatmul.mubr.bf16.vlgmr.msra.gmra.mrb[0].mxu0 %v773_v42 }
  0xd4   : > { %v514_v47 = vpop.permute.xlu0 %513  ;;  %v616_v51 = vpop.permute.xlu1 %615 }
  0xd8   : > { %v623_v57 = vpop.permute.xlu1 %622 }
 0x18b   : > { %v605_v43 = vpop.f32.mrb[0].mxu1 }
 0x18c   : > { %v792_v44 = vpop.f32.mrb[1].mxu1 }
 0x18d   : > { %v608_v45 = vpop.f32.mrb[2].mxu1 }
 0x18e   : > { %v793_v46 = vpop.f32.mrb[3].mxu1 }
 0x19f   : > { %v560_v48 = vpop.f32.mrb[0].mxu0 }
 0x1a0   : > { %v561_v49 = vadd.f32 %v560_v48, %v514_v47  ;;  %v562_v50 = vpop.f32.mrb[1].mxu0 }
 0x1a1   : > { %v563_v52 = vpop.f32.mrb[2].mxu0 }
 0x1a2   : > { %v566_v53 = vmax.f32 %v561_v49, 0.0  ;;  %v564_v54 = vpop.f32.mrb[3].mxu0 }
 0x1a4   : > { %v612_v55 = vadd.f32 %v605_v43, %v566_v53 }
 0x1a6   : > { %v618_v56 = vmul.f32 %v616_v51, %v612_v55 }
 0x1a8   : > { %v625_v58 = vadd.f32 %v623_v57, %v618_v56 }
 0x1aa   : > { %626 = vst [vmem:[%s982_s15] sm:$0xff] %v625_v58 }
 0x1ab PF: > { %s16_s25 = sadd.s32 1, %s890_s25   ;;  %s1064_s21 = smov %s882_s23 }
 0x1ac   : > { %p13_p10 = scmp.ge.s32.totalorder %s16_s25, 8   ;;  %s1065_s22 = smov %s886_s24 }
 0x1ad   : > { %s1066_s23 = smov %s1069_s26  ;;  %s1067_s24 = smov %s1073_s27 }
 0x1ae   :  { %15 = sbr.rel (!%p13_p10) target bundleno = 3 (0x3), region = 186 }
 0x1b5   :  { %654 = vsyncmov [#allocation4] }
 0x1b8   :  { %s655_s15 = vpop.sfrf %654 }
 0x1b9   :  { %p779_p11 = scmp.ne.s32.totalorder %s655_s15, 0 }
 0x1bb   :  { %659 = shalt.err (%p779_p11)  }
 0x1bc   :  { %661 = vsyncmov [#allocation4 + $0x1] }
 0x1bf   :  { %s662_s11 = vpop.sfrf %661 }
 0x1c0   :  { %p780_p12 = scmp.ne.s32.totalorder %s662_s11, 0 }
 0x1c2   :  { %666 = shalt.err (%p780_p12)  }

</bundles_post_ra>
